<compile_context>
chip_gen: v5e
topology: v5e:2x2
jax: 0.10.0
libtpu: 0.0.40
codegen_flags: <defaults>
</compile_context>

<pallas_src>
import functools

import jax
import jax.numpy as jnp
from jax.experimental import pallas as pl
from jax.experimental.pallas import tpu as pltpu

OUT_PAD = 128  # lane-dense padded output width for the final Linear(H -> 2)


def _round_up(n, m):
    return ((n + m - 1) // m) * m


def mlp_diffusion_kernel(x_ref, waug_ref, w2_ref, w3_ref, w4_ref, b4_ref, o_ref):
    tile_b = x_ref.shape[0]
    K, H3 = waug_ref.shape
    H = w2_ref.shape[0]

    # x_ref columns: [x0, x1, bitcast(t), 0]
    xv = x_ref[...]                                            # (tile_b, 4) f32
    x0 = xv[:, 0:1]
    x1 = xv[:, 1:2]
    t = pltpu.bitcast(xv[:, 2:3], jnp.int32)                   # (tile_b, 1) int32

    # Build the augmented "one-hot" matrix A in-kernel (pure VPU work):
    #   A[:, t]     = 1        -> selects emb1|emb2|emb3 row
    #   A[:, K - 3] = 1        -> adds b1|b2|b3 row
    #   A[:, K - 2] = x[:, 0]  -> adds x0 * (w1[0]|0|0)
    #   A[:, K - 1] = x[:, 1]  -> adds x1 * (w1[1]|0|0)
    steps = jax.lax.broadcasted_iota(jnp.int32, (tile_b, K), 1)
    a = ((steps == t).astype(jnp.float32)
         + (steps == K - 3).astype(jnp.float32)
         + jnp.where(steps == K - 2, x0, 0.0)
         + jnp.where(steps == K - 1, x1, 0.0)).astype(jnp.bfloat16)

    # Single bf16 MXU pass: r = [x@w1 + b1 + e1 | b2 + e2 | b3 + e3], f32 accumulation.
    r = jnp.dot(a, waug_ref[...], preferred_element_type=jnp.float32)   # (tile_b, 3H)

    h = jnp.maximum(r[:, 0:H], 0.0)

    h = jnp.dot(h.astype(jnp.bfloat16), w2_ref[...],
                preferred_element_type=jnp.float32) + r[:, H:2 * H]
    h = jnp.maximum(h, 0.0)

    h = jnp.dot(h.astype(jnp.bfloat16), w3_ref[...],
                preferred_element_type=jnp.float32) + r[:, 2 * H:3 * H]
    h = jnp.maximum(h, 0.0)

    # Output: Linear(H -> 2), zero-padded to a lane-dense (tile_b, 128) slab, bf16 MXU pass.
    out = jnp.dot(h.astype(jnp.bfloat16), w4_ref[...],
                  preferred_element_type=jnp.float32) + b4_ref[...]
    o_ref[...] = out.astype(o_ref.dtype)


def prepare_params(p):
    """One-time conversion of the f32 model params into the kernel layout:
    bf16 augmented [emb|bias|w1] table, bf16 H x H weights, lane-padded bf16 w4 / f32 b4."""
    H = p["w1"].shape[1]
    n_steps = p["emb1"].shape[0]
    K = _round_up(n_steps + 3, 128)           # one-hot width: steps + [bias, x0, x1] rows
    H3 = 3 * H

    table = jnp.zeros((K, H3), jnp.float32)
    table = table.at[:n_steps, :].set(
        jnp.concatenate([p["emb1"], p["emb2"], p["emb3"]], axis=1))
    table = table.at[K - 3, :].set(
        jnp.concatenate([p["b1"], p["b2"], p["b3"]], axis=0))
    table = table.at[K - 2, :H].set(p["w1"][0])
    table = table.at[K - 1, :H].set(p["w1"][1])

    w4p = jnp.pad(p["w4"], ((0, 0), (0, OUT_PAD - p["w4"].shape[1])))          # (H, 128)
    b4p = jnp.pad(p["b4"].reshape(1, -1), ((0, 0), (0, OUT_PAD - p["b4"].shape[0])))

    return dict(
        w_aug=table.astype(jnp.bfloat16),      # (K, 3H) bf16: emb + biases + w1 rows
        w2=p["w2"].astype(jnp.bfloat16),       # (H, H)
        w3=p["w3"].astype(jnp.bfloat16),       # (H, H)
        w4p=w4p.astype(jnp.bfloat16),          # (H, 128) zero-padded
        b4p=b4p.astype(jnp.float32),           # (1, 128) zero-padded, added post-accumulation
    )


@functools.partial(jax.jit, static_argnames=("tile_b",))
def mlp_diffusion_forward(x, t, kp, *, tile_b=512):
    """x: (B, 2) f32, t: (B,) int32, kp: prepare_params(...) output."""
    B = x.shape[0]
    H = kp["w2"].shape[0]
    K, H3 = kp["w_aug"].shape

    # Big tiles amortize per-step overhead / fill the 256-wide MXU (v6e/v7x), but clamp so
    # there are >= 2 tiles whenever B > 128 (keeps v7x's two TensorCores busy); 128 floor
    # keeps v5e's 128-row MXU full.
    tile_b = min(tile_b, max(128, _round_up(pl.cdiv(B, 2), 8)), _round_up(B, 8))
    B_pad = _round_up(B, tile_b)
    num_tiles = B_pad // tile_b

    # Pack t (bitcast to f32) into a spare column of x: one input DMA per grid step.
    t_bits = jax.lax.bitcast_convert_type(t.astype(jnp.int32), jnp.float32)
    x_packed = jnp.concatenate(
        [x.astype(jnp.float32), t_bits[:, None], jnp.zeros((B, 1), jnp.float32)], axis=1)
    x_packed = jnp.pad(x_packed, ((0, B_pad - B), (0, 0)))     # (B_pad, 4)

    const_spec = lambda a: pl.BlockSpec(a.shape, lambda i: (0,) * a.ndim)
    in_specs = [
        pl.BlockSpec((tile_b, 4), lambda i: (i, 0)),   # packed x / t
        const_spec(kp["w_aug"]),                       # weights / biases / embeddings stay
        const_spec(kp["w2"]),                          # resident in VMEM (constant index_map)
        const_spec(kp["w3"]),
        const_spec(kp["w4p"]),
        const_spec(kp["b4p"]),
    ]

    flops = int(2 * B_pad * (K * H3            # fused gather + layer 1 + all biases
                             + H * H + H * H   # layers 2-3
                             + H * OUT_PAD))   # padded output layer
    param_bytes = sum(int(a.size * a.dtype.itemsize) for a in kp.values())
    bytes_accessed = int(x_packed.size * 4 + param_bytes + B_pad * OUT_PAD * 4)

    out = pl.pallas_call(
        mlp_diffusion_kernel,
        out_shape=jax.ShapeDtypeStruct((B_pad, OUT_PAD), jnp.float32),
        grid=(num_tiles,),
        in_specs=in_specs,
        out_specs=pl.BlockSpec((tile_b, OUT_PAD), lambda i: (i, 0)),
        compiler_params=pltpu.CompilerParams(
            dimension_semantics=("parallel",),          # v7x: split batch tiles over 2 TCs
            vmem_limit_bytes=32 * 1024 * 1024),
        cost_estimate=pl.CostEstimate(flops=flops, transcendentals=0,
                                      bytes_accessed=bytes_accessed),
    )(x_packed, kp["w_aug"], kp["w2"], kp["w3"], kp["w4p"], kp["b4p"])

    return out[:B, :2]


def init_params(key, n_steps, num_units):
    """Deterministic init matching the PyTorch module's parameter shapes.
    nn.Linear stores (out, in); we store transposed (in, out) for row-major matmul."""
    ks = jax.random.split(key, 11)

    def linear(kw, kb, fan_in, fan_out):
        bound = 1.0 / jnp.sqrt(fan_in)
        w = jax.random.uniform(kw, (fan_in, fan_out), jnp.float32, -bound, bound)
        b = jax.random.uniform(kb, (fan_out,), jnp.float32, -bound, bound)
        return w, b

    w1, b1 = linear(ks[0], ks[1], 2, num_units)
    w2, b2 = linear(ks[2], ks[3], num_units, num_units)
    w3, b3 = linear(ks[4], ks[5], num_units, num_units)
    w4, b4 = linear(ks[6], ks[7], num_units, 2)

    # nn.Embedding default init: N(0, 1)
    emb1 = jax.random.normal(ks[8], (n_steps, num_units), jnp.float32)
    emb2 = jax.random.normal(ks[9], (n_steps, num_units), jnp.float32)
    emb3 = jax.random.normal(ks[10], (n_steps, num_units), jnp.float32)

    return dict(w1=w1, b1=b1, w2=w2, b2=b2, w3=w3, b3=b3, w4=w4, b4=b4,
                emb1=emb1, emb2=emb2, emb3=emb3)


def reference_forward(x, t, p, *, match_kernel_precision=False):
    """Pure-JAX reference reproducing the PyTorch forward.
    With match_kernel_precision=True, all matmul operands / biases / embeddings are rounded
    through bf16 exactly like the kernel's bf16 MXU passes (f32 accumulation); b4 stays f32."""
    hp = jax.lax.Precision.HIGHEST
    if match_kernel_precision:
        mk = lambda a: a.astype(jnp.bfloat16).astype(jnp.float32)
    else:
        mk = lambda a: a

    e1, e2, e3 = mk(p["emb1"])[t], mk(p["emb2"])[t], mk(p["emb3"])[t]
    h = jnp.dot(mk(x), mk(p["w1"]), precision=hp) + mk(p["b1"]) + e1
    h = jnp.maximum(h, 0.0)
    h = jnp.dot(mk(h), mk(p["w2"]), precision=hp) + mk(p["b2"]) + e2
    h = jnp.maximum(h, 0.0)
    h = jnp.dot(mk(h), mk(p["w3"]), precision=hp) + mk(p["b3"]) + e3
    h = jnp.maximum(h, 0.0)
    return jnp.dot(mk(h), mk(p["w4"]), precision=hp) + p["b4"]


if __name__ == "__main__":
    key = jax.random.PRNGKey(0)
    n_steps = 100
    num_units = 128
    batch = 200  # not a multiple of the batch tile -> exercises padding + the >=2-tile clamp

    kp_key, kx, kt = jax.random.split(key, 3)
    params = init_params(kp_key, n_steps, num_units)
    x = jax.random.normal(kx, (batch, 2), jnp.float32)
    t = jax.random.randint(kt, (batch,), 0, n_steps, jnp.int32)

    kernel_params = prepare_params(params)
    out = mlp_diffusion_forward(x, t, kernel_params)
    out = jax.block_until_ready(out)

    assert out.shape == (batch, 2)

    # Tight check vs a reference using the kernel's bf16 operand precision (f32 accumulation).
    ref_matched = reference_forward(x, t, params, match_kernel_precision=True)
    assert jnp.allclose(out, ref_matched, atol=2e-3, rtol=2e-3), \
        "mismatch vs precision-matched reference"

    # Loose semantic check vs the pure-f32 PyTorch-equivalent forward.
    ref_f32 = reference_forward(x, t, params, match_kernel_precision=False)
    assert jnp.allclose(out, ref_f32, atol=5e-2, rtol=5e-2), "mismatch vs f32 reference"

    print("KERNEL_OK")
</pallas_src>

<mosaic_0001>
module attributes {stable_mosaic.version = 11 : i64} {
  func.func @mlp_diffusion_kernel(%arg0: i32, %arg1: memref<128x4xf32, #tpu.memory_space<vmem>>, %arg2: memref<128x384xbf16, #tpu.memory_space<vmem>>, %arg3: memref<128x128xbf16, #tpu.memory_space<vmem>>, %arg4: memref<128x128xbf16, #tpu.memory_space<vmem>>, %arg5: memref<128x128xbf16, #tpu.memory_space<vmem>>, %arg6: memref<1x128xf32, #tpu.memory_space<vmem>>, %arg7: memref<128x128xf32, #tpu.memory_space<vmem>>) attributes {dimension_semantics = [#tpu.dimension_semantics<parallel>], iteration_bounds = array<i64: 2>, scalar_prefetch = 0 : i64, scratch_operands = 0 : i64, tpu.core_type = #tpu.core_type<tc>, window_params = [{transform_indices = @transform_0, window_bounds = array<i64: 128, 4>}, {pipeline_mode = #tpu.pipeline_mode<synchronous>, transform_indices = @transform_1, window_bounds = array<i64: 128, 384>}, {pipeline_mode = #tpu.pipeline_mode<synchronous>, transform_indices = @transform_2, window_bounds = array<i64: 128, 128>}, {pipeline_mode = #tpu.pipeline_mode<synchronous>, transform_indices = @transform_3, window_bounds = array<i64: 128, 128>}, {pipeline_mode = #tpu.pipeline_mode<synchronous>, transform_indices = @transform_4, window_bounds = array<i64: 128, 128>}, {pipeline_mode = #tpu.pipeline_mode<synchronous>, transform_indices = @transform_5, window_bounds = array<i64: 1, 128>}, {transform_indices = @transform_6, window_bounds = array<i64: 128, 128>}]} {
    %c0 = arith.constant 0 : index
    %c0_0 = arith.constant 0 : index
    %0 = vector.load %arg1[%c0, %c0_0] : memref<128x4xf32, #tpu.memory_space<vmem>>, vector<128x4xf32>
    %1 = vector.extract_strided_slice %0 {offsets = [0, 0], sizes = [128, 1], strides = [1, 1]} : vector<128x4xf32> to vector<128x1xf32>
    %2 = vector.extract_strided_slice %0 {offsets = [0, 1], sizes = [128, 1], strides = [1, 1]} : vector<128x4xf32> to vector<128x1xf32>
    %3 = vector.extract_strided_slice %0 {offsets = [0, 2], sizes = [128, 1], strides = [1, 1]} : vector<128x4xf32> to vector<128x1xf32>
    %4 = tpu.bitcast %3 : vector<128x1xf32> -> vector<128x1xi32>
    %5 = tpu.iota {dimensions = array<i32: 1>} : vector<128x128xi32>
    %6 = vector.broadcast %4 : vector<128x1xi32> to vector<128x128xi32>
    %7 = arith.cmpi eq, %5, %6 : vector<128x128xi32>
    %8 = arith.extui %7 : vector<128x128xi1> to vector<128x128xi32>
    %9 = arith.sitofp %8 : vector<128x128xi32> to vector<128x128xf32>
    %c125_i32 = arith.constant 125 : i32
    %10 = vector.broadcast %c125_i32 : i32 to vector<128x128xi32>
    %11 = arith.cmpi eq, %5, %10 : vector<128x128xi32>
    %12 = arith.extui %11 : vector<128x128xi1> to vector<128x128xi32>
    %13 = arith.sitofp %12 : vector<128x128xi32> to vector<128x128xf32>
    %14 = arith.addf %9, %13 : vector<128x128xf32>
    %c126_i32 = arith.constant 126 : i32
    %15 = vector.broadcast %c126_i32 : i32 to vector<128x128xi32>
    %16 = arith.cmpi eq, %5, %15 : vector<128x128xi32>
    %cst = arith.constant 0.000000e+00 : f32
    %17 = vector.shape_cast %1 : vector<128x1xf32> to vector<128x1xf32>
    %18 = vector.broadcast %17 : vector<128x1xf32> to vector<128x128xf32>
    %19 = vector.broadcast %cst : f32 to vector<128x128xf32>
    %20 = arith.select %16, %18, %19 : vector<128x128xi1>, vector<128x128xf32>
    %21 = arith.addf %14, %20 : vector<128x128xf32>
    %c127_i32 = arith.constant 127 : i32
    %22 = vector.broadcast %c127_i32 : i32 to vector<128x128xi32>
    %23 = arith.cmpi eq, %5, %22 : vector<128x128xi32>
    %cst_1 = arith.constant 0.000000e+00 : f32
    %24 = vector.shape_cast %2 : vector<128x1xf32> to vector<128x1xf32>
    %25 = vector.broadcast %24 : vector<128x1xf32> to vector<128x128xf32>
    %26 = vector.broadcast %cst_1 : f32 to vector<128x128xf32>
    %27 = arith.select %23, %25, %26 : vector<128x128xi1>, vector<128x128xf32>
    %28 = arith.addf %21, %27 : vector<128x128xf32>
    %29 = arith.truncf %28 : vector<128x128xf32> to vector<128x128xbf16>
    %c0_2 = arith.constant 0 : index
    %c0_3 = arith.constant 0 : index
    %30 = vector.load %arg2[%c0_2, %c0_3] : memref<128x384xbf16, #tpu.memory_space<vmem>>, vector<128x384xbf16>
    %cst_4 = arith.constant dense<0.000000e+00> : vector<128x384xf32>
    %31 = tpu.matmul %29, %30, %cst_4 {dimension_numbers = #tpu.dot_dimension_numbers<[1], [0], [0], [1], [0, 0, 1, 1], [], []>} : vector<128x128xbf16>, vector<128x384xbf16>, vector<128x384xf32> -> vector<128x384xf32>
    %32 = vector.extract_strided_slice %31 {offsets = [0, 0], sizes = [128, 128], strides = [1, 1]} : vector<128x384xf32> to vector<128x128xf32>
    %cst_5 = arith.constant 0.000000e+00 : f32
    %33 = vector.broadcast %cst_5 : f32 to vector<128x128xf32>
    %34 = arith.maximumf %32, %33 : vector<128x128xf32>
    %35 = arith.truncf %34 : vector<128x128xf32> to vector<128x128xbf16>
    %c0_6 = arith.constant 0 : index
    %c0_7 = arith.constant 0 : index
    %36 = vector.load %arg3[%c0_6, %c0_7] : memref<128x128xbf16, #tpu.memory_space<vmem>>, vector<128x128xbf16>
    %cst_8 = arith.constant dense<0.000000e+00> : vector<128x128xf32>
    %37 = tpu.matmul %35, %36, %cst_8 {dimension_numbers = #tpu.dot_dimension_numbers<[1], [0], [0], [1], [0, 0, 1, 1], [], []>} : vector<128x128xbf16>, vector<128x128xbf16>, vector<128x128xf32> -> vector<128x128xf32>
    %38 = vector.extract_strided_slice %31 {offsets = [0, 128], sizes = [128, 128], strides = [1, 1]} : vector<128x384xf32> to vector<128x128xf32>
    %39 = arith.addf %37, %38 : vector<128x128xf32>
    %cst_9 = arith.constant 0.000000e+00 : f32
    %40 = vector.broadcast %cst_9 : f32 to vector<128x128xf32>
    %41 = arith.maximumf %39, %40 : vector<128x128xf32>
    %42 = arith.truncf %41 : vector<128x128xf32> to vector<128x128xbf16>
    %c0_10 = arith.constant 0 : index
    %c0_11 = arith.constant 0 : index
    %43 = vector.load %arg4[%c0_10, %c0_11] : memref<128x128xbf16, #tpu.memory_space<vmem>>, vector<128x128xbf16>
    %cst_12 = arith.constant dense<0.000000e+00> : vector<128x128xf32>
    %44 = tpu.matmul %42, %43, %cst_12 {dimension_numbers = #tpu.dot_dimension_numbers<[1], [0], [0], [1], [0, 0, 1, 1], [], []>} : vector<128x128xbf16>, vector<128x128xbf16>, vector<128x128xf32> -> vector<128x128xf32>
    %45 = vector.extract_strided_slice %31 {offsets = [0, 256], sizes = [128, 128], strides = [1, 1]} : vector<128x384xf32> to vector<128x128xf32>
    %46 = arith.addf %44, %45 : vector<128x128xf32>
    %cst_13 = arith.constant 0.000000e+00 : f32
    %47 = vector.broadcast %cst_13 : f32 to vector<128x128xf32>
    %48 = arith.maximumf %46, %47 : vector<128x128xf32>
    %49 = arith.truncf %48 : vector<128x128xf32> to vector<128x128xbf16>
    %c0_14 = arith.constant 0 : index
    %c0_15 = arith.constant 0 : index
    %50 = vector.load %arg5[%c0_14, %c0_15] : memref<128x128xbf16, #tpu.memory_space<vmem>>, vector<128x128xbf16>
    %cst_16 = arith.constant dense<0.000000e+00> : vector<128x128xf32>
    %51 = tpu.matmul %49, %50, %cst_16 {dimension_numbers = #tpu.dot_dimension_numbers<[1], [0], [0], [1], [0, 0, 1, 1], [], []>} : vector<128x128xbf16>, vector<128x128xbf16>, vector<128x128xf32> -> vector<128x128xf32>
    %c0_17 = arith.constant 0 : index
    %c0_18 = arith.constant 0 : index
    %52 = vector.load %arg6[%c0_17, %c0_18] : memref<1x128xf32, #tpu.memory_space<vmem>>, vector<1x128xf32>
    %53 = vector.broadcast %52 : vector<1x128xf32> to vector<128x128xf32>
    %54 = arith.addf %51, %53 : vector<128x128xf32>
    %c0_19 = arith.constant 0 : index
    %c0_20 = arith.constant 0 : index
    %55 = vector.load %arg7[%c0_19, %c0_20] : memref<128x128xf32, #tpu.memory_space<vmem>>, vector<128x128xf32>
    tpu.vector_store %arg7[%c0_19, %c0_20], %54 {strides = array<i32>} : memref<128x128xf32, #tpu.memory_space<vmem>>, vector<128x128xf32>,
    return
  }
  func.func @transform_0(%arg0: i32) -> (i32, i32) {
    %c0_i32 = arith.constant 0 : i32
    %c0_i32_0 = arith.constant 0 : i32
    return %arg0, %c0_i32 : i32, i32
  }
  func.func @transform_1(%arg0: i32) -> (i32, i32) {
    %c0_i32 = arith.constant 0 : i32
    %c0_i32_0 = arith.constant 0 : i32
    %c0_i32_1 = arith.constant 0 : i32
    return %c0_i32, %c0_i32_0 : i32, i32
  }
  func.func @transform_2(%arg0: i32) -> (i32, i32) {
    %c0_i32 = arith.constant 0 : i32
    %c0_i32_0 = arith.constant 0 : i32
    %c0_i32_1 = arith.constant 0 : i32
    return %c0_i32, %c0_i32_0 : i32, i32
  }
  func.func @transform_3(%arg0: i32) -> (i32, i32) {
    %c0_i32 = arith.constant 0 : i32
    %c0_i32_0 = arith.constant 0 : i32
    %c0_i32_1 = arith.constant 0 : i32
    return %c0_i32, %c0_i32_0 : i32, i32
  }
  func.func @transform_4(%arg0: i32) -> (i32, i32) {
    %c0_i32 = arith.constant 0 : i32
    %c0_i32_0 = arith.constant 0 : i32
    %c0_i32_1 = arith.constant 0 : i32
    return %c0_i32, %c0_i32_0 : i32, i32
  }
  func.func @transform_5(%arg0: i32) -> (i32, i32) {
    %c0_i32 = arith.constant 0 : i32
    %c0_i32_0 = arith.constant 0 : i32
    %c0_i32_1 = arith.constant 0 : i32
    return %c0_i32, %c0_i32_0 : i32, i32
  }
  func.func @transform_6(%arg0: i32) -> (i32, i32) {
    %c0_i32 = arith.constant 0 : i32
    %c0_i32_0 = arith.constant 0 : i32
    return %arg0, %c0_i32 : i32, i32
  }
}

</mosaic_0001>

<bundles_post_ra>
// kernel: mlp_diffusion_forward.1
= control target key start
LH: loop header
LB: loop body
LE: loop exit
PB: predicated region body
PF: predicated region fallthrough
CT: control target
= control target key end

     0   :  { %s1783_s21 = smov 0   ;;  %s2310_s0 = inlined_call_operand.vmem [shape: f32[256,4], index: 0, kind: input, shape index: {}]   ;;  %s2311_s1 = inlined_call_operand.vmem [shape: bf16[128,384], index: 1, kind: input, shape index: {}]   ;;  %s2312_s2 = inlined_call_operand.vmem [shape: bf16[128,128], index: 2, kind: input, shape index: {}]   ;;  %s2313_s3 = inlined_call_operand.vmem [shape: bf16[128,128], index: 3, kind: input, shape index: {}]   ;;  %s2314_s4 = inlined_call_operand.vmem [shape: bf16[128,128], index: 4, kind: input, shape index: {}]   ;;  %s2315_s5 = inlined_call_operand.vmem [shape: f32[1,128], index: 5, kind: input, shape index: {}]   ;;  %s2316_s6 = inlined_call_operand.vmem [shape: f32[256,128], index: 6, kind: output, shape index: {}]  }
   0x1 LB: > { %s1400_s22 = sadd.s32 4294967295, %s1742_s21   ;;  %p1404_p0 = scmp.ge.s32.totalorder %s1742_s21, 1  ;;  %s1742_s21 = sphi %s1783_s21, %s16_s21  }
   0x2   : > { %p213_p1 = scmp.lt.s32.totalorder %s1742_s21, 3 }
   0x4   : > { %p214_p2 = pnand %p1404_p0, %p213_p1 }
   0x5   : > { %s1405_s23 = sshll.u32 (!%p214_p2), %s1400_s22, 4 }
   0x6   : > { %217 = sbr.rel (%p214_p2) target bundleno = 854 (0x356), region = 44  ;;  %p244_p3 = scmp.lt.s32.totalorder (!%p214_p2), %s1405_s23, 31 }
   0xb   : > { %v1744_v0 = vmov 0   ;;  %v1745_v1 = vmov 2   ;;  %v1746_v2 = vmov 1   ;;  %s2318_s23 = smov (!%p244_p3, %s1405_s23), 31  ;;  %v1512_v13 = vld [vmem:[%s2311_s1 + $0xa8] sm:$0xf] }
   0xc   : > { %1697 = vset.pattern.permute.xlu1 %v1744_v0  ;;  %1696 = vset.pattern.permute.xlu0 %v1745_v1  ;;  %s1406_s24 = sshll.u32 %s2318_s23, 3  ;;  %v1642_v14 = vld [vmem:[%s2311_s1 + $0xb0] sm:$0xf0]  ;;  %v1641_v15 = vld [vmem:[%s2311_s1 + $0xac] sm:$0xf] }
   0xd   : > { %1698 = vset.pattern.permute.xlu2 %v1746_v2  ;;  %s1802_s27 = scalar_lea.vmem %s2310_s0, %s1406_s24  ;;  %v1513_v16 = vor.u32 %v1642_v14, %v1512_v13  ;;  %v1514_v17 = vld [vmem:[%s2311_s1 + $0xb4] sm:$0xf0]  ;;  %v1500_v18 = vld [vmem:[%s2311_s1 + $0x90] sm:$0xf]  ;;  %v1639_v19 = vld [vmem:[%s2311_s1 + $0x98] sm:$0xf0] }
   0xe   : > { %v255_v3 = vld [vmem:[%s1802_s27] sm:$0xff]  ;;  %v256_v4 = vld [vmem:[%s1802_s27 + $0x8] sm:$0xff]  ;;  %v257_v5 = vld [vmem:[%s1802_s27 + $0x10] sm:$0xff]  ;;  %v1517_v20 = vor.u32 %v1641_v15, %v1514_v17  ;;  %v1501_v23 = vor.u32 %v1639_v19, %v1500_v18 }
   0xf   : > { %406 = vperm.xlu1 %1697, %v255_v3   ;;  %290 = vperm.xlu0 %1696, %v255_v3   ;;  %v258_v6 = vld [vmem:[%s1802_s27 + $0x18] sm:$0xff]  ;;  %v259_v7 = vld [vmem:[%s1802_s27 + $0x20] sm:$0xff]  ;;  %v260_v8 = vld [vmem:[%s1802_s27 + $0x28] sm:$0xff] }
  0x10   : > { %503 = vperm.xlu2 %1698, %v255_v3   ;;  %v261_v9 = vld [vmem:[%s1802_s27 + $0x30] sm:$0xff]  ;;  %v262_v10 = vld [vmem:[%s1802_s27 + $0x38] sm:$0xff]  ;;  %v1825_v11 = vld [vmem:[%s1802_s27 + $0x48] sm:$0xff]  ;;  %766 = vmatpush.bf16.msra.mxu0 %v1513_v16 }
  0x11   : > { %v1832_v12 = vld [vmem:[%s1802_s27 + $0x50] sm:$0xff]  ;;  %v1502_v22 = vld [vmem:[%s2311_s1 + $0x9c] sm:$0xf0]  ;;  %1668 = vmatpush.bf16.msra.mxu2 %v1513_v16  ;;  %815 = vmatpush.bf16.msra.mxu1 %v1517_v20  ;;  %v1863_v26 = vld [vmem:[%s1802_s27 + $0x58] sm:$0xff] }
  0x12   : > { %v1638_v21 = vld [vmem:[%s2311_s1 + $0x94] sm:$0xf]  ;;  %v263_v25 = vld [vmem:[%s1802_s27 + $0x40] sm:$0xff]  ;;  %1676 = vmatpush.bf16.msra.mxu3 %v1517_v20  ;;  %v1488_v27 = vld [vmem:[%s2311_s1 + $0x78] sm:$0xf] }
  0x13   : > { %v1505_v24 = vor.u32 %v1638_v21, %v1502_v22  ;;  %v1636_v28 = vld [vmem:[%s2311_s1 + $0x80] sm:$0xf0]  ;;  %v1635_v29 = vld [vmem:[%s2311_s1 + $0x7c] sm:$0xf]  ;;  %v1490_v31 = vld [vmem:[%s2311_s1 + $0x84] sm:$0xf0] }
  0x14   : > { %767 = vmatpush.bf16.msra.mxu0 %v1501_v23  ;;  %v1489_v30 = vor.u32 %v1636_v28, %v1488_v27  ;;  %v1476_v32 = vld [vmem:[%s2311_s1 + $0x60] sm:$0xf]  ;;  %v1633_v33 = vld [vmem:[%s2311_s1 + $0x68] sm:$0xf0]  ;;  %v1493_v34 = vor.u32 %v1635_v29, %v1490_v31  ;;  %v1632_v35 = vld [vmem:[%s2311_s1 + $0x64] sm:$0xf] }
  0x15   : > { %1669 = vmatpush.bf16.msra.mxu2 %v1501_v23  ;;  %816 = vmatpush.bf16.msra.mxu1 %v1505_v24  ;;  %v1478_v36 = vld [vmem:[%s2311_s1 + $0x6c] sm:$0xf0]  ;;  %v1477_v37 = vor.u32 %v1633_v33, %v1476_v32  ;;  %v1895_v39 = vld [vmem:[%s1802_s27 + $0x60] sm:$0xff]  ;;  %v1464_v40 = vld [vmem:[%s2311_s1 + $0x48] sm:$0xf] }
  0x16   : > { %1677 = vmatpush.bf16.msra.mxu3 %v1505_v24  ;;  %v1481_v38 = vor.u32 %v1632_v35, %v1478_v36  ;;  %v1630_v41 = vld [vmem:[%s2311_s1 + $0x50] sm:$0xf0]  ;;  %v1629_v42 = vld [vmem:[%s2311_s1 + $0x4c] sm:$0xf]  ;;  %v1466_v44 = vld [vmem:[%s2311_s1 + $0x54] sm:$0xf0] }
  0x17   : > { %410 = vperm.xlu1 %1697, %v256_v4   ;;  %293 = vperm.xlu0 %1696, %v256_v4   ;;  %v1465_v43 = vor.u32 %v1630_v41, %v1464_v40  ;;  %v1469_v45 = vor.u32 %v1629_v42, %v1466_v44  ;;  %v1452_v46 = vld [vmem:[%s2311_s1 + $0x30] sm:$0xf]  ;;  %v1627_v47 = vld [vmem:[%s2311_s1 + $0x38] sm:$0xf0]  ;;  %v1626_v48 = vld [vmem:[%s2311_s1 + $0x34] sm:$0xf] }
  0x18   : > { %507 = vperm.xlu2 %1698, %v256_v4   ;;  %768 = vmatpush.bf16.msra.mxu0 %v1489_v30  ;;  %v1453_v49 = vor.u32 %v1627_v47, %v1452_v46  ;;  %v1454_v50 = vld [vmem:[%s2311_s1 + $0x3c] sm:$0xf0]  ;;  %v1440_v52 = vld [vmem:[%s2311_s1 + $0x18] sm:$0xf]  ;;  %v1624_v53 = vld [vmem:[%s2311_s1 + $0x20] sm:$0xf0] }
  0x19   : > { %1670 = vmatpush.bf16.msra.mxu2 %v1489_v30  ;;  %817 = vmatpush.bf16.msra.mxu1 %v1493_v34  ;;  %v1457_v51 = vor.u32 %v1626_v48, %v1454_v50  ;;  %v1623_v54 = vld [vmem:[%s2311_s1 + $0x1c] sm:$0xf]  ;;  %v268_v55 = vld [vmem:[%s1802_s27 + $0x68] sm:$0xff]  ;;  %v1441_v56 = vor.u32 %v1624_v53, %v1440_v52  ;;  %v1428_v59 = vld [vmem:[%s2311_s1] sm:$0xf] }
  0x1a   : > { %1678 = vmatpush.bf16.msra.mxu3 %v1493_v34  ;;  %v1442_v57 = vld [vmem:[%s2311_s1 + $0x24] sm:$0xf0]  ;;  %v1621_v60 = vld [vmem:[%s2311_s1 + $0x8] sm:$0xf0]  ;;  %v1620_v61 = vld [vmem:[%s2311_s1 + $0x4] sm:$0xf] }
  0x1b   : > { %v1445_v58 = vor.u32 %v1623_v54, %v1442_v57  ;;  %v1429_v62 = vor.u32 %v1621_v60, %v1428_v59  ;;  %v1430_v63 = vld [vmem:[%s2311_s1 + $0xc] sm:$0xf0]  ;;  %v270_v34 = vld [vmem:[%s1802_s27 + $0x78] sm:$0xff] }
  0x1c   : > { %769 = vmatpush.bf16.msra.mxu0 %v1477_v37  ;;  %v1433_v3 = vor.u32 %v1620_v61, %v1430_v63 }
  0x1d   : > { %1671 = vmatpush.bf16.msra.mxu2 %v1477_v37  ;;  %818 = vmatpush.bf16.msra.mxu1 %v1481_v38 }
  0x1e   : > { %1679 = vmatpush.bf16.msra.mxu3 %v1481_v38 }
  0x1f   : > { %1699 = vset.pattern.permute.xlu1 %v1745_v1  ;;  %296 = vperm.xlu0 %1696, %v257_v5  }
  0x20   : > { %299 = vperm.xlu1 %1699, %v258_v6   ;;  %1700 = vset.pattern.permute.xlu2 %v1744_v0 }
  0x21   : > { %414 = vperm.xlu2 %1700, %v257_v5   ;;  %770 = vmatpush.bf16.msra.mxu0 %v1465_v43 }
  0x22   : > { %1672 = vmatpush.bf16.msra.mxu2 %v1465_v43  ;;  %819 = vmatpush.bf16.msra.mxu1 %v1469_v45 }
  0x23   : > { %1680 = vmatpush.bf16.msra.mxu3 %v1469_v45 }
  0x25   : > { %771 = vmatpush.bf16.msra.mxu0 %v1453_v49 }
  0x26   : > { %1673 = vmatpush.bf16.msra.mxu2 %v1453_v49  ;;  %820 = vmatpush.bf16.msra.mxu1 %v1457_v51 }
  0x27   : > { %1701 = vset.pattern.permute.xlu0 %v1744_v0  ;;  %1681 = vmatpush.bf16.msra.mxu3 %v1457_v51 }
  0x28   : > { %1702 = vset.pattern.permute.xlu1 %v1746_v2  ;;  %418 = vperm.xlu0 %1701, %v258_v6  }
  0x29   : > { %511 = vperm.xlu1 %1702, %v257_v5   ;;  %1703 = vset.pattern.permute.xlu2 %v1746_v2  ;;  %v1956_v5 = vld [vmem:[%s1802_s27 + $0x70] sm:$0xff]  ;;  %s2289_s27 = scalar_lea.vmem %s2316_s6, %s1406_s24 }
  0x2a   : > { %515 = vperm.xlu2 %1703, %v258_v6   ;;  %772 = vmatpush.bf16.msra.mxu0 %v1441_v56  ;;  %v287_v6 = vlaneseq }
  0x2b   : > { %1674 = vmatpush.bf16.msra.mxu2 %v1441_v56  ;;  %821 = vmatpush.bf16.msra.mxu1 %v1445_v58 }
  0x2c   : > { %1682 = vmatpush.bf16.msra.mxu3 %v1445_v58 }
  0x2e   : > { %773 = vmatpush.bf16.msra.mxu0 %v1429_v62 }
  0x2f   : > { %822 = vmatpush.bf16.msra.mxu1 %v1433_v3  ;;  %1675 = vmatpush.bf16.msra.mxu2 %v1429_v62 }
  0x30   : > { %422 = vperm.xlu0 %1701, %v259_v7   ;;  %1683 = vmatpush.bf16.msra.mxu3 %v1433_v3 }
  0x31   : > { %1704 = vset.pattern.permute.xlu1 %v1745_v1 }
  0x32   : > { %302 = vperm.xlu1 %1704, %v259_v7   ;;  %1705 = vset.pattern.permute.xlu2 %v1745_v1 }
  0x33   : > { %305 = vperm.xlu2 %1705, %v260_v8  }
  0x38   : > { %1708 = vset.pattern.permute.xlu0 %v1746_v2 }
  0x39   : > { %523 = vperm.xlu0 %1708, %v260_v8  }
  0x3a   : > { %1706 = vset.pattern.permute.xlu1 %v1744_v0 }
  0x3b   : > { %426 = vperm.xlu1 %1706, %v260_v8   ;;  %1707 = vset.pattern.permute.xlu2 %v1746_v2  ;;  %v1963_v8 = vand.u32 127, %v287_v6 }
  0x3c   : > { %519 = vperm.xlu2 %1707, %v259_v7  }
  0x3d   : > { %vm385_vm0 = vcmp.eq.s32.totalorder %v1963_v8, 125  ;;  %vm404_vm2 = vcmp.eq.s32.totalorder %v1963_v8, 126  ;;  %vm501_vm3 = vcmp.eq.s32.totalorder %v1963_v8, 127 }
  0x41   : > { %527 = vperm.xlu0 %1708, %v261_v9  }
  0x43   : > { %1709 = vset.pattern.permute.xlu1 %v1745_v1 }
  0x44   : > { %308 = vperm.xlu1 %1709, %v261_v9   ;;  %1710 = vset.pattern.permute.xlu2 %v1745_v1 }
  0x45   : > { %311 = vperm.xlu2 %1710, %v262_v10  }
  0x49   : > { %1715 = vset.pattern.permute.xlu0 %v1745_v1 }
  0x4a   : > { %317 = vperm.xlu0 %1715, %v1825_v11  }
  0x4c   : > { %1711 = vset.pattern.permute.xlu1 %v1744_v0 }
  0x4d   : > { %430 = vperm.xlu1 %1711, %v261_v9   ;;  %1712 = vset.pattern.permute.xlu2 %v1744_v0 }
  0x4e   : > { %434 = vperm.xlu2 %1712, %v262_v10  }
  0x52   : > { %320 = vperm.xlu0 %1715, %v1832_v12  }
  0x55   : > { %1713 = vset.pattern.permute.xlu1 %v1746_v2 }
  0x56   : > { %531 = vperm.xlu1 %1713, %v262_v10   ;;  %1714 = vset.pattern.permute.xlu2 %v1745_v1 }
  0x57   : > { %314 = vperm.xlu2 %1714, %v263_v25  }
  0x5a   : > { %1722 = vset.pattern.permute.xlu0 %v1744_v0 }
  0x5b   : > { %450 = vperm.xlu0 %1722, %v1863_v26  }
  0x5e   : > { %1716 = vset.pattern.permute.xlu1 %v1744_v0 }
  0x5f   : > { %438 = vperm.xlu1 %1716, %v263_v25   ;;  %1717 = vset.pattern.permute.xlu2 %v1744_v0 }
  0x60   : > { %442 = vperm.xlu2 %1717, %v1825_v11  }
  0x63   : > { %454 = vperm.xlu0 %1722, %v1895_v39  }
  0x67   : > { %1718 = vset.pattern.permute.xlu1 %v1746_v2 }
  0x68   : > { %535 = vperm.xlu1 %1718, %v263_v25   ;;  %1719 = vset.pattern.permute.xlu2 %v1746_v2 }
  0x69   : > { %539 = vperm.xlu2 %1719, %v1825_v11   ;;  %v1747_v11 = vmov 0.0  }
  0x6a   : > { %v504_v4 = vpop.permute.xlu2 %503 }
  0x6b   : > { %1729 = vset.pattern.permute.xlu0 %v1746_v2  ;;  %v566_v22 = vsel %vm501_vm3, %v504_v4, 0.0 }
  0x6c   : > { %555 = vperm.xlu0 %1729, %v268_v55  }
  0x70   : > { %1720 = vset.pattern.permute.xlu1 %v1745_v1 }
  0x71   : > { %323 = vperm.xlu1 %1720, %v1863_v26   ;;  %1721 = vset.pattern.permute.xlu2 %v1744_v0 }
  0x72   : > { %446 = vperm.xlu2 %1721, %v1832_v12   ;;  %v508_v7 = vpop.permute.xlu2 %507 }
  0x73   : > { %v567_v25 = vsel %vm501_vm3, %v508_v7, 0.0 }
  0x74   : > { %559 = vperm.xlu0 %1729, %v1956_v5  }
  0x79   : > { %1723 = vset.pattern.permute.xlu1 %v1746_v2 }
  0x7a   : > { %543 = vperm.xlu1 %1723, %v1832_v12   ;;  %1724 = vset.pattern.permute.xlu2 %v1746_v2  ;;  %v1971_v12 = vsel %vm385_vm0, 1.0, %v1747_v11 }
  0x7b   : > { %547 = vperm.xlu2 %1724, %v1863_v26   ;;  %v415_v14 = vpop.permute.xlu2 %414 }
  0x7c   : > { %v471_v35 = vsel %vm404_vm2, %v415_v14, 0.0 }
  0x81   : > { %v407_v9 = vpop.permute.xlu1 %406  ;;  %v291_v10 = vpop.permute.xlu0 %290 }
  0x82   : > { %vm337_vm1 = vcmp.eq.s32.totalorder %v1963_v8, %v291_v10  ;;  %1725 = vset.pattern.permute.xlu1 %v1745_v1  ;;  %v469_v18 = vsel %vm404_vm2, %v407_v9, 0.0 }
  0x83   : > { %326 = vperm.xlu1 %1725, %v1895_v39   ;;  %1726 = vset.pattern.permute.xlu2 %v1745_v1  ;;  %v1409_v13 = vsel %vm337_vm1, 1.0, %v1747_v11 }
  0x84   : > { %329 = vperm.xlu2 %1726, %v268_v55   ;;  %v388_v15 = vadd.f32 %v1971_v12, %v1409_v13  ;;  %v516_v28 = vpop.permute.xlu2 %515 }
  0x85   : > { %v569_v41 = vsel %vm501_vm3, %v516_v28, 0.0 }
  0x86   : > { %v485_v20 = vadd.f32 %v469_v18, %v388_v15 }
  0x88   : > { %v582_v26 = vadd.f32 %v566_v22, %v485_v20 }
  0x89   : > { %v411_v16 = vpop.permute.xlu1 %410  ;;  %v294_v17 = vpop.permute.xlu0 %293 }
  0x8a   : > { %vm338_vm4 = vcmp.eq.s32.totalorder %v1963_v8, %v294_v17  ;;  %v470_v23 = vsel %vm404_vm2, %v411_v16, 0.0 }
  0x8b   : > { %v1410_v19 = vsel %vm338_vm4, 1.0, %v1747_v11  ;;  %1727 = vset.pattern.permute.xlu1 %v1744_v0 }
  0x8c   : > { %v389_v21 = vadd.f32 %v1971_v12, %v1410_v19  ;;  %458 = vperm.xlu1 %1727, %v268_v55   ;;  %1728 = vset.pattern.permute.xlu2 %v1746_v2 }
  0x8d   : > { %551 = vperm.xlu2 %1728, %v1895_v39   ;;  %v306_v40 = vpop.permute.xlu2 %305 }
  0x8e   : > { %v486_v24 = vadd.f32 %v470_v23, %v389_v21  ;;  %vm342_vm7 = vcmp.eq.s32.totalorder %v1963_v8, %v306_v40 }
  0x90   : > { %v583_v27 = vadd.f32 %v567_v25, %v486_v24 }
  0x91   : > { %v297_v29 = vpop.permute.xlu0 %296 }
  0x92   : > { %v300_v30 = vpop.permute.xlu1 %299  ;;  %vm339_vm5 = vcmp.eq.s32.totalorder %v1963_v8, %v297_v29  ;;  %v1992_v31 = vpack.c.bf16 %v583_v27, %v582_v26 }
  0x93   : > { %v1411_v32 = vsel %vm339_vm5, 1.0, %v1747_v11  ;;  %vm340_vm6 = vcmp.eq.s32.totalorder %v1963_v8, %v300_v30 }
  0x94   : > { %1730 = vset.pattern.permute.xlu1 %v1745_v1  ;;  %774 = vmatmul.bf16.vlgmr.msra.gmra.mxu0 %v1992_v31  ;;  %v390_v33 = vadd.f32 %v1971_v12, %v1411_v32  ;;  %v1412_v36 = vsel %vm340_vm6, 1.0, %v1747_v11 }
  0x95   : > { %823 = vmatmul.bf16.vlgmr.msra.gmra.mxu1 %v1992_v31  ;;  %332 = vperm.xlu1 %1730, %v1956_v5   ;;  %v391_v37 = vadd.f32 %v1971_v12, %v1412_v36 }
  0x96   : > { %1731 = vset.pattern.permute.xlu2 %v1745_v1  ;;  %v487_v39 = vadd.f32 %v471_v35, %v390_v33  ;;  %v520_v50 = vpop.permute.xlu2 %519 }
  0x97   : > { %335 = vperm.xlu2 %1731, %v270_v34   ;;  %v570_v59 = vsel %vm501_vm3, %v520_v50, 0.0 }
  0x9a   : > { %v419_v38 = vpop.permute.xlu0 %418 }
  0x9b   : > { %v472_v42 = vsel %vm404_vm2, %v419_v38, 0.0  ;;  %v512_v43 = vpop.permute.xlu1 %511 }
  0x9c   : > { %v488_v44 = vadd.f32 %v472_v42, %v391_v37  ;;  %v568_v1 = vsel %vm501_vm3, %v512_v43, 0.0 }
  0x9d   : > { %1732 = vset.pattern.permute.xlu1 %v1744_v0  ;;  %v584_v46 = vadd.f32 %v568_v1, %v487_v39 }
  0x9e   : > { %v585_v45 = vadd.f32 %v569_v41, %v488_v44  ;;  %462 = vperm.xlu1 %1732, %v1956_v5  }
  0x9f   : > { %1733 = vset.pattern.permute.xlu2 %v1744_v0  ;;  %v1414_v0 = vsel %vm342_vm7, 1.0, %v1747_v11  ;;  %v312_v56 = vpop.permute.xlu2 %311 }
  0xa0   : > { %466 = vperm.xlu2 %1733, %v270_v34   ;;  %v2016_v47 = vpack.c.bf16 %v585_v45, %v584_v46  ;;  %v393_v54 = vadd.f32 %v1971_v12, %v1414_v0  ;;  %vm344_vm10 = vcmp.eq.s32.totalorder %v1963_v8, %v312_v56  ;;  %v1651_v46 = vld [vmem:[%s2312_s2 + $0x38] sm:$0xff] }
  0xa1   : > { %v1416_v10 = vsel %vm344_vm10, 1.0, %v1747_v11  ;;  %1001 = vmatpush.bf16.msrb.mxu3 %v1651_v46  ;;  %v1628_v46 = vld [vmem:[%s2311_s1 + $0x40] sm:$0xf0] }
  0xa2   : > { %v423_v48 = vpop.permute.xlu0 %422  ;;  %v395_v16 = vadd.f32 %v1971_v12, %v1416_v10 }
  0xa3   : > { %v473_v53 = vsel %vm404_vm2, %v423_v48, 0.0 }
  0xa4   : > { %v303_v49 = vpop.permute.xlu1 %302  ;;  %779 = vmatmul.bf16.gmra.mxu0 %v2016_v47 }
  0xa5   : > { %vm341_vm8 = vcmp.eq.s32.totalorder %v1963_v8, %v303_v49  ;;  %828 = vmatmul.bf16.gmra.mxu1 %v2016_v47 }
  0xa6   : > { %v1413_v51 = vsel %vm341_vm8, 1.0, %v1747_v11  ;;  %1734 = vset.pattern.permute.xlu1 %v1746_v2 }
  0xa7   : > { %563 = vperm.xlu1 %1734, %v270_v34   ;;  %v392_v52 = vadd.f32 %v1971_v12, %v1413_v51 }
  0xa8   : > { %v435_v5 = vpop.permute.xlu2 %434 }
  0xa9   : > { %v489_v57 = vadd.f32 %v473_v53, %v392_v52  ;;  %v476_v17 = vsel %vm404_vm2, %v435_v5, 0.0  ;;  %v1650_v52 = vld [vmem:[%s2312_s2 + $0x30] sm:$0xff] }
  0xaa   : > { %v492_v20 = vadd.f32 %v476_v17, %v395_v16  ;;  %1002 = vmatpush.bf16.msrb.mxu3 %v1650_v52  ;;  %v1648_v16 = vld [vmem:[%s2312_s2 + $0x20] sm:$0xff] }
  0xab   : > { %v524_v55 = vpop.permute.xlu0 %523  ;;  %v586_v62 = vadd.f32 %v570_v59, %v489_v57  ;;  %v1520_v59 = vld [vmem:[%s2311_s1 + $0xb0] sm:$0xf]  ;;  %v1496_v17 = vld [vmem:[%s2311_s1 + $0x80] sm:$0xf] }
  0xac   : > { %v571_v60 = vsel %vm501_vm3, %v524_v55, 0.0 }
  0xad   : > { %v427_v58 = vpop.permute.xlu1 %426 }
  0xae   : > { %v474_v2 = vsel %vm404_vm2, %v427_v58, 0.0  ;;  %v1649_v58 = vld [vmem:[%s2312_s2 + $0x28] sm:$0xff] }
  0xaf   : > { %v490_v61 = vadd.f32 %v474_v2, %v393_v54  ;;  %v1643_v2 = vld [vmem:[%s2311_s1 + $0xb8] sm:$0xf0]  ;;  %1003 = vmatpush.bf16.msrb.mxu3 %v1649_v58  ;;  %v1644_v58 = vld [vmem:[%s2312_s2] sm:$0xff] }
  0xb1   : > { %v587_v63 = vadd.f32 %v571_v60, %v490_v61  ;;  %v315_v7 = vpop.permute.xlu2 %314  ;;  %v1521_v61 = vor.u32 %v1643_v2, %v1520_v59 }
  0xb2   : > { %vm345_vm12 = vcmp.eq.s32.totalorder %v1963_v8, %v315_v7 }
  0xb3   : > { %v2035_v3 = vpack.c.bf16 %v587_v63, %v586_v62  ;;  %v528_v13 = vpop.permute.xlu0 %527  ;;  %v1417_v32 = vsel %vm345_vm12, 1.0, %v1747_v11  ;;  %864 = vmatpush.bf16.msrb.mxu2 %v1521_v61  ;;  %1004 = vmatpush.bf16.msrb.mxu3 %v1648_v16 }
  0xb4   : > { %v572_v19 = vsel %vm501_vm3, %v528_v13, 0.0  ;;  %v396_v35 = vadd.f32 %v1971_v12, %v1417_v32  ;;  %v1508_v13 = vld [vmem:[%s2311_s1 + $0x98] sm:$0xf] }
  0xb5   : > { %784 = vmatmul.bf16.gmra.mxu0 %v2035_v3  ;;  %833 = vmatmul.bf16.gmra.mxu1 %v2035_v3 }
  0xb6   : > { %v309_v4 = vpop.permute.xlu1 %308 }
  0xb7   : > { %vm343_vm9 = vcmp.eq.s32.totalorder %v1963_v8, %v309_v4 }
  0xb8   : > { %v1415_v9 = vsel %vm343_vm9, 1.0, %v1747_v11 }
  0xb9   : > { %v394_v15 = vadd.f32 %v1971_v12, %v1415_v9 }
  0xba   : > { %v443_v26 = vpop.permute.xlu2 %442 }
  0xbb   : > { %v478_v33 = vsel %vm404_vm2, %v443_v26, 0.0 }
  0xbc   : > { %v318_v23 = vpop.permute.xlu0 %317 }
  0xbd   : > { %vm346_vm11 = vcmp.eq.s32.totalorder %v1963_v8, %v318_v23 }
  0xbe   : > { %v1418_v28 = vsel %vm346_vm11, 1.0, %v1747_v11 }
  0xbf   : > { %v431_v6 = vpop.permute.xlu1 %430  ;;  %v397_v30 = vadd.f32 %v1971_v12, %v1418_v28 }
  0xc0   : > { %v475_v14 = vsel %vm404_vm2, %v431_v6, 0.0 }
  0xc1   : > { %v491_v18 = vadd.f32 %v475_v14, %v394_v15  ;;  %v494_v36 = vadd.f32 %v478_v33, %v397_v30  ;;  %v1640_v14 = vld [vmem:[%s2311_s1 + $0xa0] sm:$0xf0] }
  0xc2   : > { %v1509_v15 = vor.u32 %v1640_v14, %v1508_v13 }
  0xc3   : > { %v588_v24 = vadd.f32 %v572_v19, %v491_v18  ;;  %v540_v34 = vpop.permute.xlu2 %539  ;;  %v1637_v18 = vld [vmem:[%s2311_s1 + $0x88] sm:$0xf0] }
  0xc4   : > { %v575_v38 = vsel %vm501_vm3, %v540_v34, 0.0  ;;  %v321_v42 = vpop.permute.xlu0 %320  ;;  %865 = vmatpush.bf16.msrb.mxu2 %v1509_v15 }
  0xc5   : > { %v591_v40 = vadd.f32 %v575_v38, %v494_v36  ;;  %vm347_vm13 = vcmp.eq.s32.totalorder %v1963_v8, %v321_v42  ;;  %v1631_v36 = vld [vmem:[%s2311_s1 + $0x58] sm:$0xf0] }
  0xc6   : > { %v1419_v50 = vsel %vm347_vm13, 1.0, %v1747_v11 }
  0xc7   : > { %v398_v54 = vadd.f32 %v1971_v12, %v1419_v50  ;;  %v1448_v50 = vld [vmem:[%s2311_s1 + $0x20] sm:$0xf] }
  0xc8   : > { %v532_v21 = vpop.permute.xlu1 %531 }
  0xc9   : > { %v573_v22 = vsel %vm501_vm3, %v532_v21, 0.0 }
  0xca   : > { %v589_v25 = vadd.f32 %v573_v22, %v492_v20  ;;  %v1497_v20 = vor.u32 %v1637_v18, %v1496_v17 }
  0xcc   : > { %v2053_v27 = vpack.c.bf16 %v589_v25, %v588_v24  ;;  %v447_v45 = vpop.permute.xlu2 %446  ;;  %866 = vmatpush.bf16.msrb.mxu2 %v1497_v20  ;;  %v1484_v24 = vld [vmem:[%s2311_s1 + $0x68] sm:$0xf]  ;;  %v1634_v25 = vld [vmem:[%s2311_s1 + $0x70] sm:$0xf0] }
  0xcd   : > { %v451_v49 = vpop.permute.xlu0 %450  ;;  %v479_v56 = vsel %vm404_vm2, %v447_v45, 0.0  ;;  %v1485_v28 = vor.u32 %v1634_v25, %v1484_v24  ;;  %v1460_v45 = vld [vmem:[%s2311_s1 + $0x38] sm:$0xf] }
  0xce   : > { %789 = vmatmul.bf16.gmra.mxu0 %v2053_v27  ;;  %838 = vmatmul.bf16.gmra.mxu1 %v2053_v27  ;;  %v480_v53 = vsel %vm404_vm2, %v451_v49, 0.0  ;;  %v495_v62 = vadd.f32 %v479_v56, %v398_v54  ;;  %v1461_v49 = vor.u32 %v1628_v46, %v1460_v45  ;;  %v1436_v56 = vld [vmem:[%s2311_s1 + $0x8] sm:$0xf] }
  0xd0   : > { %867 = vmatpush.bf16.msrb.mxu2 %v1485_v28 }
  0xd1   : > { %v439_v29 = vpop.permute.xlu1 %438 }
  0xd2   : > { %v477_v37 = vsel %vm404_vm2, %v439_v29, 0.0 }
  0xd3   : > { %v493_v39 = vadd.f32 %v477_v37, %v396_v35  ;;  %v1472_v35 = vld [vmem:[%s2311_s1 + $0x50] sm:$0xf] }
  0xd5   : > { %v548_v55 = vpop.permute.xlu2 %547  ;;  %v455_v10 = vpop.permute.xlu0 %454 }
  0xd6   : > { %v577_v60 = vsel %vm501_vm3, %v548_v55, 0.0  ;;  %v481_v26 = vsel %vm404_vm2, %v455_v10, 0.0 }
  0xda   : > { %v536_v41 = vpop.permute.xlu1 %535 }
  0xdb   : > { %v574_v43 = vsel %vm501_vm3, %v536_v41, 0.0  ;;  %v1473_v41 = vor.u32 %v1631_v36, %v1472_v35 }
  0xdc   : > { %v590_v44 = vadd.f32 %v574_v43, %v493_v39 }
  0xdd   : > { %868 = vmatpush.bf16.msrb.mxu2 %v1473_v41 }
  0xde   : > { %v2071_v1 = vpack.c.bf16 %v591_v40, %v590_v44  ;;  %v330_v9 = vpop.permute.xlu2 %329  ;;  %v556_v32 = vpop.permute.xlu0 %555  ;;  %v1647_v40 = vld [vmem:[%s2312_s2 + $0x18] sm:$0xff] }
  0xdf   : > { %vm350_vm15 = vcmp.eq.s32.totalorder %v1963_v8, %v330_v9  ;;  %v579_v39 = vsel %vm501_vm3, %v556_v32, 0.0  ;;  %1005 = vmatpush.bf16.msrb.mxu3 %v1647_v40 }
  0xe0   : > { %794 = vmatmul.bf16.vlgmr.msra.gmra.mxu2 %v2071_v1  ;;  %843 = vmatmul.bf16.vlgmr.msra.gmra.mxu3 %v2071_v1  ;;  %v1422_v22 = vsel %vm350_vm15, 1.0, %v1747_v11 }
  0xe1   : > { %v401_v29 = vadd.f32 %v1971_v12, %v1422_v22  ;;  %869 = vmatpush.bf16.msrb.mxu2 %v1461_v49 }
  0xe3   : > { %v324_v48 = vpop.permute.xlu1 %323 }
  0xe4   : > { %vm348_vm14 = vcmp.eq.s32.totalorder %v1963_v8, %v324_v48  ;;  %v1646_v48 = vld [vmem:[%s2312_s2 + $0x10] sm:$0xff] }
  0xe5   : > { %v1420_v51 = vsel %vm348_vm14, 1.0, %v1747_v11  ;;  %1006 = vmatpush.bf16.msrb.mxu3 %v1646_v48 }
  0xe6   : > { %v399_v0 = vadd.f32 %v1971_v12, %v1420_v51  ;;  %v1625_v51 = vld [vmem:[%s2311_s1 + $0x28] sm:$0xf0]  ;;  %v560_v10 = vpop.permute.xlu0 %559 }
  0xe7   : > { %v552_v30 = vpop.permute.xlu2 %551  ;;  %v1449_v52 = vor.u32 %v1625_v51, %v1448_v50  ;;  %v580_v16 = vsel %vm501_vm3, %v560_v10, 0.0  ;;  %v1656_v51 = vld [vmem:[%s2313_s3 + $0x20] sm:$0xff] }
  0xe8   : > { %v496_v57 = vadd.f32 %v480_v53, %v399_v0  ;;  %v578_v37 = vsel %vm501_vm3, %v552_v30, 0.0  ;;  %v1645_v53 = vld [vmem:[%s2312_s2 + $0x8] sm:$0xff] }
  0xe9   : > { %870 = vmatpush.bf16.msrb.mxu2 %v1449_v52  ;;  %1007 = vmatpush.bf16.msrb.mxu3 %v1645_v53 }
  0xea   : > { %v593_v5 = vadd.f32 %v577_v60, %v496_v57  ;;  %v1622_v57 = vld [vmem:[%s2311_s1 + $0x10] sm:$0xf0] }
  0xeb   : > { %v1437_v59 = vor.u32 %v1622_v57, %v1436_v56 }
  0xec   : > { %v544_v63 = vpop.permute.xlu1 %543 }
  0xed   : > { %v576_v4 = vsel %vm501_vm3, %v544_v63, 0.0  ;;  %871 = vmatpush.bf16.msrb.mxu2 %v1437_v59  ;;  %1008 = vmatpush.bf16.msrb.mxu3 %v1644_v58  ;;  %v1654_v59 = vld [vmem:[%s2313_s3 + $0x10] sm:$0xff] }
  0xee   : > { %v592_v6 = vadd.f32 %v576_v4, %v495_v62 }
  0xf0   : > { %v2104_v7 = vpack.c.bf16 %v593_v5, %v592_v6 }
  0xf1   : > { %v336_v55 = vpop.permute.xlu2 %335 }
  0xf2   : > { %799 = vmatmul.bf16.gmra.mxu2 %v2104_v7  ;;  %848 = vmatmul.bf16.gmra.mxu3 %v2104_v7  ;;  %vm352_vm4 = vcmp.eq.s32.totalorder %v1963_v8, %v336_v55 }
  0xf3   : > { %v1424_v61 = vsel %vm352_vm4, 1.0, %v1747_v11 }
  0xf4   : > { %v403_v6 = vadd.f32 %v1971_v12, %v1424_v61 }
  0xf5   : > { %v327_v19 = vpop.permute.xlu1 %326 }
  0xf6   : > { %vm349_vm0 = vcmp.eq.s32.totalorder %v1963_v8, %v327_v19 }
  0xf7   : > { %v1421_v21 = vsel %vm349_vm0, 1.0, %v1747_v11 }
  0xf8   : > { %v400_v23 = vadd.f32 %v1971_v12, %v1421_v21 }
  0xfa   : > { %v497_v33 = vadd.f32 %v481_v26, %v400_v23  ;;  %v467_v63 = vpop.permute.xlu2 %466 }
  0xfb   : > { %v484_v9 = vsel %vm404_vm2, %v467_v63, 0.0 }
  0xfc   : > { %v594_v43 = vadd.f32 %v578_v37, %v497_v33  ;;  %v500_v14 = vadd.f32 %v484_v9, %v403_v6 }
  0xfe   : > { %v459_v34 = vpop.permute.xlu1 %458 }
  0xff   : > { %v482_v38 = vsel %vm404_vm2, %v459_v34, 0.0 }
 0x100   : > { %v498_v42 = vadd.f32 %v482_v38, %v401_v29 }
 0x102   : > { %v595_v44 = vadd.f32 %v579_v39, %v498_v42 }
 0x104   : > { %v2167_v0 = vpack.c.bf16 %v595_v44, %v594_v43 }
 0x106   : > { %804 = vmatmul.bf16.gmra.mxu2 %v2167_v0  ;;  %853 = vmatmul.bf16.gmra.mxu3 %v2167_v0 }
 0x107   : > { %v333_v54 = vpop.permute.xlu1 %332 }
 0x108   : > { %vm351_vm1 = vcmp.eq.s32.totalorder %v1963_v8, %v333_v54 }
 0x109   : > { %v1423_v60 = vsel %vm351_vm1, 1.0, %v1747_v11 }
 0x10a   : > { %v402_v5 = vadd.f32 %v1971_v12, %v1423_v60  ;;  %v1652_v60 = vld [vmem:[%s2313_s3] sm:$0xff] }
 0x110   : > { %v463_v2 = vpop.permute.xlu1 %462 }
 0x111   : > { %v775_v62 = vpop.f32.mrf.mxu0  ;;  %v483_v4 = vsel %vm404_vm2, %v463_v2, 0.0 }
 0x112   : > { %v499_v13 = vadd.f32 %v483_v4, %v402_v5  ;;  %v913_v22 = vmax.f32 %v775_v62, 0.0  ;;  %v824_v63 = vpop.f32.mrf.mxu1 }
 0x114   : > { %v596_v17 = vadd.f32 %v580_v16, %v499_v13 }
 0x119   : > { %v564_v15 = vpop.permute.xlu1 %563  ;;  %v777_v19 = vpop.f32.mrf.mxu0 }
 0x11a   : > { %v581_v11 = vsel %vm501_vm3, %v564_v15, 0.0  ;;  %v914_v21 = vmax.f32 %v777_v19, 0.0  ;;  %v826_v13 = vpop.f32.mrf.mxu1 }
 0x11b   : > { %v597_v18 = vadd.f32 %v581_v11, %v500_v14 }
 0x11c   : > { %v929_v23 = vpack.c.bf16 %v914_v21, %v913_v22 }
 0x11d   : > { %v2197_v20 = vpack.c.bf16 %v597_v18, %v596_v17 }
 0x11f   : > { %809 = vmatmul.bf16.gmra.mxu2 %v2197_v20  ;;  %858 = vmatmul.bf16.gmra.mxu3 %v2197_v20 }
 0x121   : > { %v780_v12 = vpop.f32.mrf.mxu0 }
 0x122   : > { %v915_v26 = vmax.f32 %v780_v12, 0.0  ;;  %v829_v16 = vpop.f32.mrf.mxu1 }
 0x129   : > { %v782_v24 = vpop.f32.mrf.mxu0 }
 0x12a   : > { %v916_v25 = vmax.f32 %v782_v24, 0.0  ;;  %v831_v21 = vpop.f32.mrf.mxu1 }
 0x12c   : > { %v930_v28 = vpack.c.bf16 %v916_v25, %v915_v26 }
 0x12f   : > { %872 = vmatmul.bf16.vlgmr.msrb.gmra.mxu2 %v1992_v31  ;;  %1009 = vmatmul.bf16.vlgmr.msrb.gmra.mxu3 %v929_v23 }
 0x132   : > { %v785_v8 = vpop.f32.mrf.mxu0  ;;  %v834_v26 = vpop.f32.mrf.mxu1 }
 0x133   : > { %v917_v32 = vmax.f32 %v785_v8, 0.0 }
 0x13a   : > { %v787_v29 = vpop.f32.mrf.mxu0 }
 0x13b   : > { %v918_v30 = vmax.f32 %v787_v29, 0.0 }
 0x13d   : > { %v931_v34 = vpack.c.bf16 %v918_v30, %v917_v32  ;;  %v836_v30 = vpop.f32.mrf.mxu1 }
 0x13f   : > { %877 = vmatmul.bf16.gmra.mxu2 %v2016_v47  ;;  %1014 = vmatmul.bf16.gmra.mxu3 %v930_v28 }
 0x14b   : > { %v790_v33 = vpop.f32.mrf.mxu0 }
 0x14c   : > { %v919_v31 = vmax.f32 %v790_v33, 0.0 }
 0x14f   : > { %882 = vmatmul.bf16.gmra.mxu2 %v2035_v3  ;;  %1019 = vmatmul.bf16.gmra.mxu3 %v931_v34  ;;  %v1659_v3 = vld [vmem:[%s2313_s3 + $0x38] sm:$0xff] }
 0x150   : > { %1138 = vmatpush.bf16.msrb.mxu0 %v1659_v3 }
 0x153   : > { %v792_v35 = vpop.f32.mrf.mxu0 }
 0x154   : > { %v920_v36 = vmax.f32 %v792_v35, 0.0 }
 0x156   : > { %v932_v37 = vpack.c.bf16 %v920_v36, %v919_v31 }
 0x15f   : > { %887 = vmatmul.bf16.gmra.mxu2 %v2053_v27  ;;  %1024 = vmatmul.bf16.gmra.mxu3 %v932_v37  ;;  %v1658_v27 = vld [vmem:[%s2313_s3 + $0x30] sm:$0xff]  ;;  %v839_v37 = vpop.f32.mrf.mxu1 }
 0x160   : > { %1139 = vmatpush.bf16.msrb.mxu0 %v1658_v27 }
 0x163   : > { %v795_v38 = vpop.f32.mrf.mxu2  ;;  %v2205_v47 = vpop.f32.mrf.mxu3 }
 0x164   : > { %v921_v40 = vmax.f32 %v795_v38, 0.0 }
 0x16b   : > { %v797_v39 = vpop.f32.mrf.mxu2  ;;  %v2211_v44 = vpop.f32.mrf.mxu3 }
 0x16c   : > { %v922_v41 = vmax.f32 %v797_v39, 0.0 }
 0x16e   : > { %v933_v42 = vpack.c.bf16 %v922_v41, %v921_v40  ;;  %v841_v40 = vpop.f32.mrf.mxu1 }
 0x16f   : > { %892 = vmatmul.bf16.gmra.mxu2 %v2071_v1  ;;  %v1657_v1 = vld [vmem:[%s2313_s3 + $0x28] sm:$0xff] }
 0x170   : > { %1029 = vmatmul.bf16.gmra.mxu3 %v933_v42  ;;  %1140 = vmatpush.bf16.msrb.mxu0 %v1657_v1 }
 0x174   : > { %1141 = vmatpush.bf16.msrb.mxu0 %v1656_v51 }
 0x175   : > { %v800_v43 = vpop.f32.mrf.mxu2  ;;  %v2216_v48 = vpop.f32.mrf.mxu3 }
 0x176   : > { %v923_v46 = vmax.f32 %v800_v43, 0.0 }
 0x17d   : > { %v802_v45 = vpop.f32.mrf.mxu2  ;;  %v2225_v52 = vpop.f32.mrf.mxu3 }
 0x17e   : > { %v924_v49 = vmax.f32 %v802_v45, 0.0 }
 0x17f   : > { %897 = vmatmul.bf16.gmra.mxu2 %v2104_v7  ;;  %v1655_v7 = vld [vmem:[%s2313_s3 + $0x18] sm:$0xff] }
 0x180   : > { %v934_v50 = vpack.c.bf16 %v924_v49, %v923_v46  ;;  %1142 = vmatpush.bf16.msrb.mxu0 %v1655_v7 }
 0x182   : > { %1034 = vmatmul.bf16.gmra.mxu3 %v934_v50  ;;  %v1667_v50 = vld [vmem:[%s2314_s4 + $0x38] sm:$0xff] }
 0x183   : > { %1279 = vmatpush.bf16.msrb.mxu1 %v1667_v50 }
 0x184   : > { %1143 = vmatpush.bf16.msrb.mxu0 %v1654_v59 }
 0x189   : > { %v805_v53 = vpop.f32.mrf.mxu2  ;;  %v2231_v54 = vpop.f32.mrf.mxu3 }
 0x18a   : > { %v925_v56 = vmax.f32 %v805_v53, 0.0 }
 0x18f   : > { %902 = vmatmul.bf16.gmra.mxu2 %v2167_v0  ;;  %v1653_v0 = vld [vmem:[%s2313_s3 + $0x8] sm:$0xff] }
 0x190   : > { %1144 = vmatpush.bf16.msrb.mxu0 %v1653_v0 }
 0x191   : > { %v807_v55 = vpop.f32.mrf.mxu2  ;;  %v2239_v2 = vpop.f32.mrf.mxu3 }
 0x192   : > { %v926_v57 = vmax.f32 %v807_v55, 0.0  ;;  %v1666_v55 = vld [vmem:[%s2314_s4 + $0x30] sm:$0xff] }
 0x193   : > { %1280 = vmatpush.bf16.msrb.mxu1 %v1666_v55 }
 0x194   : > { %v935_v58 = vpack.c.bf16 %v926_v57, %v925_v56  ;;  %1145 = vmatpush.bf16.msrb.mxu0 %v1652_v60 }
 0x196   : > { %1039 = vmatmul.bf16.gmra.mxu3 %v935_v58 }
 0x19f   : > { %907 = vmatmul.bf16.gmra.mxu2 %v2197_v20 }
 0x1a2   : > { %v810_v61 = vpop.f32.mrf.mxu2  ;;  %v2245_v62 = vpop.f32.mrf.mxu3 }
 0x1a3   : > { %v927_v6 = vmax.f32 %v810_v61, 0.0  ;;  %v1664_v61 = vld [vmem:[%s2314_s4 + $0x20] sm:$0xff] }
 0x1aa   : > { %v812_v4 = vpop.f32.mrf.mxu2  ;;  %v2247_v5 = vpop.f32.mrf.mxu3 }
 0x1ab   : > { %v928_v9 = vmax.f32 %v812_v4, 0.0  ;;  %v1663_v4 = vld [vmem:[%s2314_s4 + $0x18] sm:$0xff] }
 0x1ad   : > { %v936_v10 = vpack.c.bf16 %v928_v9, %v927_v6 }
 0x1af   : > { %1044 = vmatmul.bf16.gmra.mxu3 %v936_v10 }
 0x1b2   : > { %v1010_v14 = vpop.f32.mrf.mxu3 }
 0x1b3   : > { %v1011_v15 = vadd.f32 %v1010_v14, %v824_v63  ;;  %v1661_v14 = vld [vmem:[%s2314_s4 + $0x8] sm:$0xff] }
 0x1b5   : > { %v1050_v18 = vmax.f32 %v1011_v15, 0.0 }
 0x1ba   : > { %v1012_v11 = vpop.f32.mrf.mxu3 }
 0x1bb   : > { %v1013_v17 = vadd.f32 %v1012_v11, %v826_v13 }
 0x1bd   : > { %v1051_v19 = vmax.f32 %v1013_v17, 0.0 }
 0x1bf   : > { %v1066_v20 = vpack.c.bf16 %v1051_v19, %v1050_v18 }
 0x1c1   : > { %1146 = vmatmul.bf16.vlgmr.msrb.gmra.mxu0 %v1066_v20 }
 0x1c2   : > { %v1015_v12 = vpop.f32.mrf.mxu3 }
 0x1c3   : > { %v1016_v22 = vadd.f32 %v1015_v12, %v829_v16  ;;  %v873_v16 = vpop.f32.mrf.mxu2 }
 0x1c5   : > { %v1052_v25 = vmax.f32 %v1016_v22, 0.0 }
 0x1ca   : > { %v1017_v23 = vpop.f32.mrf.mxu3 }
 0x1cb   : > { %v1018_v24 = vadd.f32 %v1017_v23, %v831_v21  ;;  %v875_v17 = vpop.f32.mrf.mxu2 }
 0x1cd   : > { %v1053_v8 = vmax.f32 %v1018_v24, 0.0 }
 0x1cf   : > { %v1067_v28 = vpack.c.bf16 %v1053_v8, %v1052_v25 }
 0x1d1   : > { %1151 = vmatmul.bf16.gmra.mxu0 %v1067_v28 }
 0x1d2   : > { %v1020_v29 = vpop.f32.mrf.mxu3 }
 0x1d3   : > { %v1021_v32 = vadd.f32 %v1020_v29, %v834_v26  ;;  %v878_v22 = vpop.f32.mrf.mxu2 }
 0x1d5   : > { %v1054_v35 = vmax.f32 %v1021_v32, 0.0 }
 0x1da   : > { %v1022_v33 = vpop.f32.mrf.mxu3 }
 0x1db   : > { %v1023_v34 = vadd.f32 %v1022_v33, %v836_v30  ;;  %v880_v26 = vpop.f32.mrf.mxu2 }
 0x1dd   : > { %v1055_v36 = vmax.f32 %v1023_v34, 0.0 }
 0x1df   : > { %v1068_v31 = vpack.c.bf16 %v1055_v36, %v1054_v35 }
 0x1e1   : > { %1156 = vmatmul.bf16.gmra.mxu0 %v1068_v31 }
 0x1e2   : > { %v1025_v38 = vpop.f32.mrf.mxu3 }
 0x1e3   : > { %v1026_v39 = vadd.f32 %v1025_v38, %v839_v37  ;;  %v883_v33 = vpop.f32.mrf.mxu2 }
 0x1e5   : > { %v1056_v3 = vmax.f32 %v1026_v39, 0.0 }
 0x1ea   : > { %v1027_v41 = vpop.f32.mrf.mxu3 }
 0x1eb   : > { %v1028_v42 = vadd.f32 %v1027_v41, %v841_v40  ;;  %v885_v37 = vpop.f32.mrf.mxu2 }
 0x1ed   : > { %v1057_v43 = vmax.f32 %v1028_v42, 0.0 }
 0x1ef   : > { %v1069_v27 = vpack.c.bf16 %v1057_v43, %v1056_v3 }
 0x1f1   : > { %1161 = vmatmul.bf16.gmra.mxu0 %v1069_v27 }
 0x1f3   : > { %v1030_v45 = vpop.f32.mrf.mxu3  ;;  %v888_v41 = vpop.f32.mrf.mxu2 }
 0x1f4   : > { %v1031_v46 = vadd.f32 %v1030_v45, %v2205_v47  ;;  %v1665_v47 = vld [vmem:[%s2314_s4 + $0x28] sm:$0xff] }
 0x1f5   : > { %1281 = vmatpush.bf16.msrb.mxu1 %v1665_v47 }
 0x1f6   : > { %v1058_v51 = vmax.f32 %v1031_v46, 0.0 }
 0x1f9   : > { %1282 = vmatpush.bf16.msrb.mxu1 %v1664_v61 }
 0x1fb   : > { %v1032_v49 = vpop.f32.mrf.mxu3  ;;  %v890_v46 = vpop.f32.mrf.mxu2 }
 0x1fc   : > { %v1033_v1 = vadd.f32 %v1032_v49, %v2211_v44 }
 0x1fd   : > { %1283 = vmatpush.bf16.msrb.mxu1 %v1663_v4 }
 0x1fe   : > { %v1059_v53 = vmax.f32 %v1033_v1, 0.0 }
 0x200   : > { %v1070_v7 = vpack.c.bf16 %v1059_v53, %v1058_v51 }
 0x202   : > { %1166 = vmatmul.bf16.gmra.mxu0 %v1070_v7 }
 0x203   : > { %v893_v7 = vpop.f32.mrf.mxu2 }
 0x205   : > { %v1035_v56 = vpop.f32.mrf.mxu3 }
 0x206   : > { %v1036_v44 = vadd.f32 %v1035_v56, %v2216_v48 }
 0x208   : > { %v1060_v59 = vmax.f32 %v1036_v44, 0.0 }
 0x20b   : > { %v895_v47 = vpop.f32.mrf.mxu2 }
 0x20d   : > { %v1037_v57 = vpop.f32.mrf.mxu3 }
 0x20e   : > { %v1038_v58 = vadd.f32 %v1037_v57, %v2225_v52  ;;  %v1662_v52 = vld [vmem:[%s2314_s4 + $0x10] sm:$0xff] }
 0x20f   : > { %1284 = vmatpush.bf16.msrb.mxu1 %v1662_v52 }
 0x210   : > { %v1061_v0 = vmax.f32 %v1038_v58, 0.0 }
 0x212   : > { %v1071_v60 = vpack.c.bf16 %v1061_v0, %v1060_v59 }
 0x213   : > { %1285 = vmatpush.bf16.msrb.mxu1 %v1661_v14  ;;  %v898_v61 = vpop.f32.mrf.mxu2 }
 0x214   : > { %1171 = vmatmul.bf16.gmra.mxu0 %v1071_v60 }
 0x219   : > { %v1040_v63 = vpop.f32.mrf.mxu3 }
 0x21a   : > { %v1041_v48 = vadd.f32 %v1040_v63, %v2231_v54  ;;  %v1660_v54 = vld [vmem:[%s2314_s4] sm:$0xff] }
 0x21b   : > { %1286 = vmatpush.bf16.msrb.mxu1 %v1660_v54 }
 0x21c   : > { %v1062_v10 = vmax.f32 %v1041_v48, 0.0  ;;  %v900_v48 = vpop.f32.mrf.mxu2 }
 0x221   : > { %v1042_v6 = vpop.f32.mrf.mxu3 }
 0x222   : > { %v1043_v9 = vadd.f32 %v1042_v6, %v2239_v2 }
 0x224   : > { %v1063_v13 = vmax.f32 %v1043_v9, 0.0  ;;  %v903_v14 = vpop.f32.mrf.mxu2 }
 0x226   : > { %v1072_v15 = vpack.c.bf16 %v1063_v13, %v1062_v10 }
 0x228   : > { %1176 = vmatmul.bf16.gmra.mxu0 %v1072_v15 }
 0x232   : > { %v1045_v11 = vpop.f32.mrf.mxu3 }
 0x233   : > { %v1046_v2 = vadd.f32 %v1045_v11, %v2245_v62 }
 0x235   : > { %v1064_v20 = vmax.f32 %v1046_v2, 0.0 }
 0x23a   : > { %v1047_v18 = vpop.f32.mrf.mxu3 }
 0x23b   : > { %v1048_v19 = vadd.f32 %v1047_v18, %v2247_v5 }
 0x23d   : > { %v1065_v12 = vmax.f32 %v1048_v19, 0.0 }
 0x23e   : > { %v1147_v21 = vpop.f32.mrf.mxu0 }
 0x23f   : > { %v1073_v23 = vpack.c.bf16 %v1065_v12, %v1064_v20  ;;  %v1148_v24 = vadd.f32 %v1147_v21, %v873_v16  ;;  %v905_v16 = vpop.f32.mrf.mxu2 }
 0x241   : > { %1181 = vmatmul.bf16.gmra.mxu0 %v1073_v23  ;;  %v1187_v28 = vmax.f32 %v1148_v24, 0.0 }
 0x246   : > { %v1149_v25 = vpop.f32.mrf.mxu0 }
 0x247   : > { %v1150_v8 = vadd.f32 %v1149_v25, %v875_v17  ;;  %v908_v20 = vpop.f32.mrf.mxu2  ;;  %v1735_v25 = vld [vmem:[%s2315_s5] ss:$0 sm:$0xff] }
 0x249   : > { %v1188_v29 = vmax.f32 %v1150_v8, 0.0 }
 0x24b   : > { %v1203_v30 = vpack.c.bf16 %v1188_v29, %v1187_v28 }
 0x24d   : > { %1287 = vmatmul.bf16.vlgmr.msrb.gmra.mxu1 %v1203_v30 }
 0x24e   : > { %v1152_v32 = vpop.f32.mrf.mxu0 }
 0x24f   : > { %v1153_v62 = vadd.f32 %v1152_v32, %v878_v22  ;;  %v910_v22 = vpop.f32.mrf.mxu2 }
 0x251   : > { %v1189_v5 = vmax.f32 %v1153_v62, 0.0 }
 0x256   : > { %v1154_v34 = vpop.f32.mrf.mxu0 }
 0x257   : > { %v1155_v35 = vadd.f32 %v1154_v34, %v880_v26 }
 0x259   : > { %v1190_v36 = vmax.f32 %v1155_v35, 0.0 }
 0x25b   : > { %v1204_v31 = vpack.c.bf16 %v1190_v36, %v1189_v5 }
 0x25d   : > { %1292 = vmatmul.bf16.gmra.mxu1 %v1204_v31 }
 0x25e   : > { %v1157_v38 = vpop.f32.mrf.mxu0 }
 0x25f   : > { %v1158_v39 = vadd.f32 %v1157_v38, %v883_v33 }
 0x261   : > { %v1191_v3 = vmax.f32 %v1158_v39, 0.0 }
 0x266   : > { %v1159_v40 = vpop.f32.mrf.mxu0 }
 0x267   : > { %v1160_v42 = vadd.f32 %v1159_v40, %v885_v37 }
 0x269   : > { %v1192_v43 = vmax.f32 %v1160_v42, 0.0 }
 0x26b   : > { %v1205_v27 = vpack.c.bf16 %v1192_v43, %v1191_v3 }
 0x26d   : > { %1297 = vmatmul.bf16.gmra.mxu1 %v1205_v27 }
 0x26e   : > { %v1162_v45 = vpop.f32.mrf.mxu0 }
 0x26f   : > { %v1163_v49 = vadd.f32 %v1162_v45, %v888_v41 }
 0x271   : > { %v1193_v51 = vmax.f32 %v1163_v49, 0.0 }
 0x276   : > { %v1164_v1 = vpop.f32.mrf.mxu0 }
 0x277   : > { %v1165_v50 = vadd.f32 %v1164_v1, %v890_v46 }
 0x279   : > { %v1194_v53 = vmax.f32 %v1165_v50, 0.0 }
 0x27b   : > { %v1206_v55 = vpack.c.bf16 %v1194_v53, %v1193_v51 }
 0x27d   : > { %1302 = vmatmul.bf16.gmra.mxu1 %v1206_v55 }
 0x27f   : > { %v1167_v56 = vpop.f32.mrf.mxu0 }
 0x280   : > { %v1168_v44 = vadd.f32 %v1167_v56, %v893_v7 }
 0x282   : > { %v1195_v59 = vmax.f32 %v1168_v44, 0.0 }
 0x287   : > { %v1169_v57 = vpop.f32.mrf.mxu0 }
 0x288   : > { %v1170_v58 = vadd.f32 %v1169_v57, %v895_v47 }
 0x28a   : > { %v1196_v0 = vmax.f32 %v1170_v58, 0.0 }
 0x28c   : > { %v1207_v60 = vpack.c.bf16 %v1196_v0, %v1195_v59 }
 0x28e   : > { %1307 = vmatmul.bf16.gmra.mxu1 %v1207_v60 }
 0x291   : > { %v1172_v63 = vpop.f32.mrf.mxu0 }
 0x292   : > { %v1173_v4 = vadd.f32 %v1172_v63, %v898_v61 }
 0x294   : > { %v1197_v9 = vmax.f32 %v1173_v4, 0.0 }
 0x299   : > { %v1174_v6 = vpop.f32.mrf.mxu0 }
 0x29a   : > { %v1175_v52 = vadd.f32 %v1174_v6, %v900_v48 }
 0x29c   : > { %v1198_v10 = vmax.f32 %v1175_v52, 0.0 }
 0x29e   : > { %v1208_v13 = vpack.c.bf16 %v1198_v10, %v1197_v9 }
 0x2a0   : > { %1312 = vmatmul.bf16.gmra.mxu1 %v1208_v13 }
 0x2a5   : > { %v1177_v15 = vpop.f32.mrf.mxu0 }
 0x2a6   : > { %v1178_v54 = vadd.f32 %v1177_v15, %v903_v14 }
 0x2a8   : > { %v1199_v2 = vmax.f32 %v1178_v54, 0.0 }
 0x2ad   : > { %v1179_v11 = vpop.f32.mrf.mxu0 }
 0x2ae   : > { %v1180_v17 = vadd.f32 %v1179_v11, %v905_v16 }
 0x2b0   : > { %v1200_v18 = vmax.f32 %v1180_v17, 0.0 }
 0x2b2   : > { %v1209_v19 = vpack.c.bf16 %v1200_v18, %v1199_v2 }
 0x2b4   : > { %1317 = vmatmul.bf16.gmra.mxu1 %v1209_v19 }
 0x2be   : > { %v1182_v12 = vpop.f32.mrf.mxu0 }
 0x2bf   : > { %v1183_v21 = vadd.f32 %v1182_v12, %v908_v20 }
 0x2c1   : > { %v1201_v8 = vmax.f32 %v1183_v21, 0.0 }
 0x2c6   : > { %v1184_v23 = vpop.f32.mrf.mxu0 }
 0x2c7   : > { %v1185_v24 = vadd.f32 %v1184_v23, %v910_v22 }
 0x2c9   : > { %v1202_v26 = vmax.f32 %v1185_v24, 0.0 }
 0x2ca   : > { %v1288_v28 = vpop.f32.mrf.mxu1 }
 0x2cb   : > { %v1289_v29 = vadd.f32 %v1735_v25, %v1288_v28  ;;  %v1210_v30 = vpack.c.bf16 %v1202_v26, %v1201_v8 }
 0x2cd   : > { %1328 = vst [vmem:[%s2289_s27] sm:$0xff] %v1289_v29  ;;  %1322 = vmatmul.bf16.gmra.mxu1 %v1210_v30 }
 0x2d2   : > { %v1290_v32 = vpop.f32.mrf.mxu1 }
 0x2d3   : > { %v1291_v33 = vadd.f32 %v1735_v25, %v1290_v32 }
 0x2d5   : > { %1329 = vst [vmem:[%s2289_s27 + $0x8] sm:$0xff] %v1291_v33 }
 0x2da   : > { %v1293_v62 = vpop.f32.mrf.mxu1 }
 0x2db   : > { %v1294_v34 = vadd.f32 %v1735_v25, %v1293_v62 }
 0x2dd   : > { %1330 = vst [vmem:[%s2289_s27 + $0x10] sm:$0xff] %v1294_v34 }
 0x2e2   : > { %v1295_v35 = vpop.f32.mrf.mxu1 }
 0x2e3   : > { %v1296_v5 = vadd.f32 %v1735_v25, %v1295_v35 }
 0x2e5   : > { %1331 = vst [vmem:[%s2289_s27 + $0x18] sm:$0xff] %v1296_v5 }
 0x2ea   : > { %v1298_v36 = vpop.f32.mrf.mxu1 }
 0x2eb   : > { %v1299_v31 = vadd.f32 %v1735_v25, %v1298_v36 }
 0x2ed   : > { %1332 = vst [vmem:[%s2289_s27 + $0x20] sm:$0xff] %v1299_v31 }
 0x2f2   : > { %v1300_v37 = vpop.f32.mrf.mxu1 }
 0x2f3   : > { %v1301_v38 = vadd.f32 %v1735_v25, %v1300_v37 }
 0x2f5   : > { %1333 = vst [vmem:[%s2289_s27 + $0x28] sm:$0xff] %v1301_v38 }
 0x2fa   : > { %v1303_v39 = vpop.f32.mrf.mxu1 }
 0x2fb   : > { %v1304_v40 = vadd.f32 %v1735_v25, %v1303_v39 }
 0x2fd   : > { %1334 = vst [vmem:[%s2289_s27 + $0x30] sm:$0xff] %v1304_v40 }
 0x302   : > { %v1305_v41 = vpop.f32.mrf.mxu1 }
 0x303   : > { %v1306_v42 = vadd.f32 %v1735_v25, %v1305_v41 }
 0x305   : > { %1335 = vst [vmem:[%s2289_s27 + $0x38] sm:$0xff] %v1306_v42 }
 0x30b   : > { %v1308_v3 = vpop.f32.mrf.mxu1 }
 0x30c   : > { %v1309_v43 = vadd.f32 %v1735_v25, %v1308_v3 }
 0x30e   : > { %1336 = vst [vmem:[%s2289_s27 + $0x40] sm:$0xff] %v1309_v43 }
 0x313   : > { %v1310_v27 = vpop.f32.mrf.mxu1 }
 0x314   : > { %v1311_v45 = vadd.f32 %v1735_v25, %v1310_v27 }
 0x316   : > { %1337 = vst [vmem:[%s2289_s27 + $0x48] sm:$0xff] %v1311_v45 }
 0x31d   : > { %v1313_v46 = vpop.f32.mrf.mxu1 }
 0x31e   : > { %v1314_v49 = vadd.f32 %v1735_v25, %v1313_v46 }
 0x320   : > { %1338 = vst [vmem:[%s2289_s27 + $0x50] sm:$0xff] %v1314_v49 }
 0x325   : > { %v1315_v1 = vpop.f32.mrf.mxu1 }
 0x326   : > { %v1316_v50 = vadd.f32 %v1735_v25, %v1315_v1 }
 0x328   : > { %1339 = vst [vmem:[%s2289_s27 + $0x58] sm:$0xff] %v1316_v50 }
 0x331   : > { %v1318_v51 = vpop.f32.mrf.mxu1 }
 0x332   : > { %v1319_v53 = vadd.f32 %v1735_v25, %v1318_v51 }
 0x334   : > { %1340 = vst [vmem:[%s2289_s27 + $0x60] sm:$0xff] %v1319_v53 }
 0x339   : > { %v1320_v7 = vpop.f32.mrf.mxu1 }
 0x33a   : > { %v1321_v55 = vadd.f32 %v1735_v25, %v1320_v7 }
 0x33c   : > { %1341 = vst [vmem:[%s2289_s27 + $0x68] sm:$0xff] %v1321_v55 }
 0x34a   : > { %v1323_v56 = vpop.f32.mrf.mxu1 }
 0x34b   : > { %v1324_v47 = vadd.f32 %v1735_v25, %v1323_v56 }
 0x34d   : > { %1342 = vst [vmem:[%s2289_s27 + $0x70] sm:$0xff] %v1324_v47 }
 0x352   : > { %v1325_v44 = vpop.f32.mrf.mxu1 }
 0x353   : > { %v1326_v57 = vadd.f32 %v1735_v25, %v1325_v44 }
 0x355   : > { %1343 = vst [vmem:[%s2289_s27 + $0x78] sm:$0xff] %v1326_v57 }
 0x356 PF: > { %s16_s21 = sadd.s32 1, %s1742_s21  }
 0x357   : > { %p13_p4 = scmp.ge.s32.totalorder %s16_s21, 4  }
 0x359   :  { %15 = sbr.rel (!%p13_p4) target bundleno = 1 (0x1), region = 74 }

</bundles_post_ra>
